<compile_context>
chip_gen: v5e
topology: v5e:2x2
jax: 0.10.0
libtpu: 0.0.40
codegen_flags: <defaults>
</compile_context>

<pallas_src>
import functools

import jax
import jax.numpy as jnp
from jax import lax
from jax.experimental import pallas as pl
from jax.experimental.pallas import tpu as pltpu


def _self_output_kernel(x_ref, res_ref, w_ref, p_ref, o_ref, *, eps: float):
    # x_ref:   (TM, H) hidden_states rows (native dtype)
    # res_ref: (TM, H) residual rows (native dtype)
    # w_ref:   (H, H)  dense weight, [in, out] layout (native dtype, resident)
    # p_ref:   (3, H)  packed f32 params: [bias; gamma; beta] (resident)
    x = x_ref[...]
    w = w_ref[...]

    # Dense: y = x @ W  (MXU, native-dtype operands, f32 accumulation).
    y = jnp.dot(x, w, preferred_element_type=jnp.float32)

    bias = p_ref[0:1, :]
    gamma = p_ref[1:2, :]
    beta = p_ref[2:3, :]

    # TODO(synk): dropout omitted (eval/inference semantics -> identity).

    # Residual add (f32).
    z = y + bias + res_ref[...].astype(jnp.float32)

    # LayerNorm over the hidden dim: single-pass mean / variance.
    h = z.shape[-1]
    inv_h = 1.0 / h
    s1 = jnp.sum(z, axis=-1, keepdims=True)
    s2 = jnp.sum(z * z, axis=-1, keepdims=True)
    mean = s1 * inv_h
    var = jnp.maximum(s2 * inv_h - mean * mean, 0.0)
    inv = lax.rsqrt(var + eps)

    out = (z - mean) * inv * gamma + beta
    o_ref[...] = out.astype(o_ref.dtype)


def electra_self_output(hidden_states, input_tensor, w, b, gamma, beta,
                        eps=1e-12, row_tile=512):
    """hidden_states, input_tensor: [B, S, H]; w: [H_out, H_in] (PyTorch layout);
    b, gamma, beta: [H]. Returns [B, S, H] in hidden_states.dtype."""
    B, S, H = hidden_states.shape
    M = B * S
    dtype = hidden_states.dtype

    x2 = hidden_states.reshape(M, H)
    r2 = input_tensor.reshape(M, H)
    # One-time transpose to MXU-native [in, out] layout; feed at input precision.
    w_t = jnp.transpose(w).astype(dtype)
    params = jnp.stack([b, gamma, beta]).astype(jnp.float32)   # (3, H)

    # Row-tile size: multiple of the sublane quantum, capped by the problem.
    sub = 16 if dtype == jnp.bfloat16 else 8
    tm = row_tile
    if M <= tm:
        tm = max(sub, pl.cdiv(M, sub) * sub)
    m_pad = pl.cdiv(M, tm) * tm
    if m_pad != M:
        x2 = jnp.pad(x2, ((0, m_pad - M), (0, 0)))
        r2 = jnp.pad(r2, ((0, m_pad - M), (0, 0)))

    grid = (m_pad // tm,)

    # VMEM budget: double-buffered (x, res, out) tiles + resident weight/params.
    itemsize = jnp.dtype(dtype).itemsize
    vmem_est = 3 * 2 * tm * H * itemsize + H * H * itemsize + 3 * H * 4
    vmem_limit = min(64 << 20, max(32 << 20, 2 * vmem_est))

    flops = 2 * m_pad * H * H + 10 * m_pad * H
    bytes_accessed = (3 * m_pad * H + H * H) * itemsize + 3 * H * 4

    kernel = functools.partial(_self_output_kernel, eps=float(eps))
    out2 = pl.pallas_call(
        kernel,
        out_shape=jax.ShapeDtypeStruct((m_pad, H), dtype),
        grid_spec=pltpu.PrefetchScalarGridSpec(
            num_scalar_prefetch=0,
            grid=grid,
            in_specs=[
                pl.BlockSpec((tm, H), lambda i: (i, 0)),    # x rows (pipelined)
                pl.BlockSpec((tm, H), lambda i: (i, 0)),    # residual rows
                pl.BlockSpec((H, H), lambda i: (0, 0)),     # weight (resident)
                pl.BlockSpec((3, H), lambda i: (0, 0)),     # packed b/gamma/beta
            ],
            out_specs=pl.BlockSpec((tm, H), lambda i: (i, 0)),
        ),
        compiler_params=pltpu.CompilerParams(
            dimension_semantics=("parallel",),
            vmem_limit_bytes=int(vmem_limit),
        ),
        cost_estimate=pl.CostEstimate(
            flops=int(flops), transcendentals=int(m_pad),
            bytes_accessed=int(bytes_accessed)),
    )(x2, r2, w_t, params)

    return out2[:M].reshape(B, S, H)


def _reference(hidden_states, input_tensor, w, b, gamma, beta, eps=1e-12):
    y = jnp.einsum("bsh,oh->bso", hidden_states, w) + b
    z = y + input_tensor
    mean = jnp.mean(z, axis=-1, keepdims=True)
    var = jnp.mean((z - mean) ** 2, axis=-1, keepdims=True)
    return (z - mean) * lax.rsqrt(var + eps) * gamma + beta


if __name__ == "__main__":
    # Config: hidden_size=32, layer_norm_eps=1e-12, hidden_dropout_prob=0.1
    B, S, H = 2, 8, 32
    eps = 1e-12

    key = jax.random.PRNGKey(0)
    k1, k2, k3, k4 = jax.random.split(key, 4)

    hidden_states = jax.random.normal(k1, (B, S, H), dtype=jnp.float32)
    input_tensor = jax.random.normal(k2, (B, S, H), dtype=jnp.float32)

    # Deterministic params (shapes from nn.Linear(H,H) and nn.LayerNorm(H)).
    w = jax.random.normal(k3, (H, H), dtype=jnp.float32) * 0.02   # dense.weight [out,in]
    b = jax.random.normal(k4, (H,), dtype=jnp.float32) * 0.02     # dense.bias
    gamma = jnp.ones((H,), dtype=jnp.float32)                     # LayerNorm.weight
    beta = jnp.zeros((H,), dtype=jnp.float32)                     # LayerNorm.bias

    out = electra_self_output(hidden_states, input_tensor, w, b, gamma, beta, eps)
    out = jax.block_until_ready(out)

    ref = _reference(hidden_states, input_tensor, w, b, gamma, beta, eps)
    assert out.shape == (B, S, H)
    assert jnp.allclose(out, ref, atol=1e-4, rtol=1e-4), "mismatch vs reference"

    print("KERNEL_OK")
</pallas_src>

<mosaic_0001>
module attributes {stable_mosaic.version = 11 : i64} {
  func.func @_self_output_kernel(%arg0: i32, %arg1: memref<16x32xf32, #tpu.memory_space<vmem>>, %arg2: memref<16x32xf32, #tpu.memory_space<vmem>>, %arg3: memref<32x32xf32, #tpu.memory_space<vmem>>, %arg4: memref<3x32xf32, #tpu.memory_space<vmem>>, %arg5: memref<16x32xf32, #tpu.memory_space<vmem>>) attributes {dimension_semantics = [#tpu.dimension_semantics<parallel>], iteration_bounds = array<i64: 1>, scalar_prefetch = 0 : i64, scratch_operands = 0 : i64, tpu.core_type = #tpu.core_type<tc>, window_params = [{transform_indices = @transform_0, window_bounds = array<i64: 16, 32>}, {transform_indices = @transform_1, window_bounds = array<i64: 16, 32>}, {pipeline_mode = #tpu.pipeline_mode<synchronous>, transform_indices = @transform_2, window_bounds = array<i64: 32, 32>}, {pipeline_mode = #tpu.pipeline_mode<synchronous>, transform_indices = @transform_3, window_bounds = array<i64: 3, 32>}, {transform_indices = @transform_4, window_bounds = array<i64: 16, 32>}]} {
    %c0 = arith.constant 0 : index
    %c0_0 = arith.constant 0 : index
    %0 = vector.load %arg1[%c0, %c0_0] : memref<16x32xf32, #tpu.memory_space<vmem>>, vector<16x32xf32>
    %c0_1 = arith.constant 0 : index
    %c0_2 = arith.constant 0 : index
    %1 = vector.load %arg3[%c0_1, %c0_2] : memref<32x32xf32, #tpu.memory_space<vmem>>, vector<32x32xf32>
    %cst = arith.constant dense<0.000000e+00> : vector<16x32xf32>
    %2 = tpu.matmul %0, %1, %cst {dimension_numbers = #tpu.dot_dimension_numbers<[1], [0], [0], [1], [0, 0, 1, 1], [], []>} : vector<16x32xf32>, vector<32x32xf32>, vector<16x32xf32> -> vector<16x32xf32>
    %c0_3 = arith.constant 0 : index
    %c0_4 = arith.constant 0 : index
    %3 = vector.load %arg4[%c0_3, %c0_4] : memref<3x32xf32, #tpu.memory_space<vmem>>, vector<1x32xf32>
    %c1 = arith.constant 1 : index
    %c0_5 = arith.constant 0 : index
    %4 = vector.load %arg4[%c1, %c0_5] : memref<3x32xf32, #tpu.memory_space<vmem>>, vector<1x32xf32>
    %c2 = arith.constant 2 : index
    %c0_6 = arith.constant 0 : index
    %5 = vector.load %arg4[%c2, %c0_6] : memref<3x32xf32, #tpu.memory_space<vmem>>, vector<1x32xf32>
    %6 = vector.broadcast %3 : vector<1x32xf32> to vector<16x32xf32>
    %7 = arith.addf %2, %6 : vector<16x32xf32>
    %c0_7 = arith.constant 0 : index
    %c0_8 = arith.constant 0 : index
    %8 = vector.load %arg2[%c0_7, %c0_8] : memref<16x32xf32, #tpu.memory_space<vmem>>, vector<16x32xf32>
    %9 = arith.addf %7, %8 : vector<16x32xf32>
    %cst_9 = arith.constant dense<0.000000e+00> : vector<16xf32>
    %10 = vector.multi_reduction <add>, %9, %cst_9 [1] : vector<16x32xf32> to vector<16xf32>
    %11 = vector.shape_cast %10 : vector<16xf32> to vector<16x1xf32>
    %12 = arith.mulf %9, %9 : vector<16x32xf32>
    %cst_10 = arith.constant dense<0.000000e+00> : vector<16xf32>
    %13 = vector.multi_reduction <add>, %12, %cst_10 [1] : vector<16x32xf32> to vector<16xf32>
    %14 = vector.shape_cast %13 : vector<16xf32> to vector<16x1xf32>
    %cst_11 = arith.constant 3.125000e-02 : f32
    %15 = vector.broadcast %cst_11 : f32 to vector<16x1xf32>
    %16 = arith.mulf %11, %15 : vector<16x1xf32>
    %cst_12 = arith.constant 3.125000e-02 : f32
    %17 = vector.broadcast %cst_12 : f32 to vector<16x1xf32>
    %18 = arith.mulf %14, %17 : vector<16x1xf32>
    %19 = arith.mulf %16, %16 : vector<16x1xf32>
    %20 = arith.subf %18, %19 : vector<16x1xf32>
    %cst_13 = arith.constant 0.000000e+00 : f32
    %21 = vector.broadcast %cst_13 : f32 to vector<16x1xf32>
    %22 = arith.maximumf %20, %21 : vector<16x1xf32>
    %cst_14 = arith.constant 9.99999996E-13 : f32
    %23 = vector.broadcast %cst_14 : f32 to vector<16x1xf32>
    %24 = arith.addf %22, %23 : vector<16x1xf32>
    %25 = math.rsqrt %24 : vector<16x1xf32>
    %26 = vector.broadcast %16 : vector<16x1xf32> to vector<16x32xf32>
    %27 = arith.subf %9, %26 : vector<16x32xf32>
    %28 = vector.broadcast %25 : vector<16x1xf32> to vector<16x32xf32>
    %29 = arith.mulf %27, %28 : vector<16x32xf32>
    %30 = vector.broadcast %4 : vector<1x32xf32> to vector<16x32xf32>
    %31 = arith.mulf %29, %30 : vector<16x32xf32>
    %32 = vector.broadcast %5 : vector<1x32xf32> to vector<16x32xf32>
    %33 = arith.addf %31, %32 : vector<16x32xf32>
    %c0_15 = arith.constant 0 : index
    %c0_16 = arith.constant 0 : index
    %34 = vector.load %arg5[%c0_15, %c0_16] : memref<16x32xf32, #tpu.memory_space<vmem>>, vector<16x32xf32>
    tpu.vector_store %arg5[%c0_15, %c0_16], %33 {strides = array<i32>} : memref<16x32xf32, #tpu.memory_space<vmem>>, vector<16x32xf32>,
    return
  }
  func.func @transform_0(%arg0: i32) -> (i32, i32) {
    %c0_i32 = arith.constant 0 : i32
    %c0_i32_0 = arith.constant 0 : i32
    return %arg0, %c0_i32 : i32, i32
  }
  func.func @transform_1(%arg0: i32) -> (i32, i32) {
    %c0_i32 = arith.constant 0 : i32
    %c0_i32_0 = arith.constant 0 : i32
    return %arg0, %c0_i32 : i32, i32
  }
  func.func @transform_2(%arg0: i32) -> (i32, i32) {
    %c0_i32 = arith.constant 0 : i32
    %c0_i32_0 = arith.constant 0 : i32
    %c0_i32_1 = arith.constant 0 : i32
    return %c0_i32, %c0_i32_0 : i32, i32
  }
  func.func @transform_3(%arg0: i32) -> (i32, i32) {
    %c0_i32 = arith.constant 0 : i32
    %c0_i32_0 = arith.constant 0 : i32
    %c0_i32_1 = arith.constant 0 : i32
    return %c0_i32, %c0_i32_0 : i32, i32
  }
  func.func @transform_4(%arg0: i32) -> (i32, i32) {
    %c0_i32 = arith.constant 0 : i32
    %c0_i32_0 = arith.constant 0 : i32
    return %arg0, %c0_i32 : i32, i32
  }
}

</mosaic_0001>

<bundles_post_ra>
// kernel: tpu_custom_call.1
= control target key start
LH: loop header
LB: loop body
LE: loop exit
PB: predicated region body
PF: predicated region fallthrough
CT: control target
= control target key end

     0   :  { %9 = vsyncpa [#allocation3], 0  ;;  %s417_s0 = inlined_call_operand.hbm [shape: f32[16,32], index: 0, kind: input, shape index: {}]   ;;  %s418_s1 = inlined_call_operand.hbm [shape: f32[16,32], index: 1, kind: input, shape index: {}]   ;;  %s419_s2 = inlined_call_operand.hbm [shape: f32[32,32], index: 2, kind: input, shape index: {}]   ;;  %s420_s3 = inlined_call_operand.hbm [shape: f32[3,32], index: 3, kind: input, shape index: {}]   ;;  %s421_s4 = inlined_call_operand.hbm [shape: f32[16,32], index: 4, kind: output, shape index: {}]  }
   0x1   :  { %10 = vsyncpa [#allocation6], 0 }
   0x2   :  { %11 = vsyncpa [#allocation9], 0 }
   0x3   :  { %12 = vsyncpa [#allocation4], 0  ;;  %s30_s17 = sshll.u32 %s418_s1, 4  ;;  %s350_s18 = smov [#allocation5]   ;;  %s31_s17 = int_to_ptr.hbm [resolvable:$true] %s30_s17 }
   0x4   :  { %s32_s19 = sshll.u32 %s350_s18, 4  ;;  %s17_s22 = sshll.u32 %s417_s0, 4  ;;  %s33_s19 = int_to_ptr.vmem [resolvable:$true] %s32_s19  ;;  %s18_s22 = int_to_ptr.hbm [resolvable:$true] %s17_s22 }
   0x5   :  { %s351_s23 = smov 128   ;;  %s352_s24 = smov 8  }
   0x6   :  { %38 = dma.hbm_to_vmem [thread:$0]  %s31_s17, 256, %s33_s19, [#allocation6], %s351_s23, %s351_s23, %s352_s24  }
   0x7   :  { %s353_s25 = smov [#allocation2]   ;;  %s43_s1 = sshll.u32 %s419_s2, 4  ;;  %s44_s1 = int_to_ptr.hbm [resolvable:$true] %s43_s1 }
   0x8   :  { %s19_s26 = sshll.u32 %s353_s25, 4  ;;  %s57_s30 = sshll.u32 %s420_s3, 4  ;;  %s20_s26 = int_to_ptr.vmem [resolvable:$true] %s19_s26  ;;  %s58_s30 = int_to_ptr.hbm [resolvable:$true] %s57_s30 }
   0x9   :  { %25 = dma.hbm_to_vmem [thread:$0]  %s18_s22, 256, %s20_s26, [#allocation3], %s351_s23, %s351_s23, %s352_s24  }
   0xa   :  { %s354_s5 = smov [#allocation7]   ;;  %s355_s7 = smov [#allocation8]  }
   0xb   :  { %s45_s6 = sshll.u32 %s354_s5, 4  ;;  %s59_s2 = sshll.u32 %s355_s7, 4  ;;  %s46_s6 = int_to_ptr.vmem [resolvable:$true] %s45_s6  ;;  %s60_s2 = int_to_ptr.vmem [resolvable:$true] %s59_s2 }
   0xc   :  { %51 = dma.hbm_to_vmem [thread:$0]  %s44_s1, 512, %s46_s6, [#allocation6], %s351_s23, %s351_s23, %s352_s24  }
   0xd   :  { %62 = dma.hbm_to_vmem [thread:$0]  %s58_s30, 64, %s60_s2, [#allocation9]  }
   0xe   :  { %342 = dma.done.wait [#allocation3], 256  }
   0xf   :  { %343 = vsyncadd [#allocation3], 4294967040 }
  0x10   :  { %344 = dma.done.wait [#allocation6], 768  }
  0x11   :  { %345 = vsyncadd [#allocation6], 4294966528 }
  0x12   :  { %346 = dma.done.wait [#allocation9], 64  }
  0x13   :  { %347 = vsyncadd [#allocation9], 4294967232  ;;  %v84_v0 = vld [vmem:[#allocation7 + $0x18] sm:$0xff]  ;;  %v83_v1 = vld [vmem:[#allocation7 + $0x10] sm:$0xff]  ;;  %vm89_vm0 = vcmask 261120   ;;  %s356_s3 = smov [#allocation10]  }
  0x14   :  { %108 = vmatpush.msra.mxu0 %v84_v0  ;;  %204 = vmatpush.msra.mxu1 %v84_v0  ;;  %v82_v2 = vld [vmem:[#allocation7 + $0x8] sm:$0xff]  ;;  %v81_v3 = vld [vmem:[#allocation7] sm:$0xff]  ;;  %v119_v8 = vld [vmem:[#allocation5] sm:$0xff]  ;;  %s185_s8 = sshll.u32 %s356_s3, 4  ;;  %s187_s11 = sshll.u32 %s421_s4, 4  ;;  %s186_s8 = int_to_ptr.vmem [resolvable:$true] %s185_s8  ;;  %s188_s11 = int_to_ptr.hbm [resolvable:$true] %s187_s11 }
  0x15   :  { %v79_v4 = vld [vmem:[#allocation2] sm:$0xff]  ;;  %v80_v5 = vld [vmem:[#allocation2 + $0x8] sm:$0xff]  ;;  %v120_v12 = vld [vmem:[#allocation5 + $0x8] sm:$0xff] }
  0x16   :  { %109 = vmatpush.msra.mxu0 %v83_v1  ;;  %205 = vmatpush.msra.mxu1 %v83_v1  ;;  %v215_v6 = vld [vmem:[#allocation8] ss:$0 sm:$0xff]  ;;  %v216_v46 = vld [vmem:[#allocation8 + $0x1] ss:$0 sm:$0xff]  ;;  %v217_v50 = vld [vmem:[#allocation8 + $0x2] ss:$0 sm:$0xff] }
  0x18   :  { %110 = vmatpush.msra.mxu0 %v82_v2  ;;  %206 = vmatpush.msra.mxu1 %v82_v2 }
  0x1a   :  { %111 = vmatpush.msra.mxu0 %v81_v3  ;;  %207 = vmatpush.msra.mxu1 %v81_v3 }
  0x1b   :  { %202 = vmatmul.msk.f32.vlgmr.msra.gmra.mxu0 %vm89_vm0, %v79_v4  ;;  %203 = vmatmul.msk.f32.vlgmr.msra.gmra.mxu1 %vm89_vm0, %v80_v5 }
  0x98   :  { %v113_v7 = vpop.f32.mrf.mxu0  ;;  %v116_v9 = vpop.f32.mrf.mxu1 }
  0x99   :  { %v114_v10 = vadd.f32 %v215_v6, %v113_v7  ;;  %v117_v11 = vadd.f32 %v215_v6, %v116_v9 }
  0x9b   :  { %v121_v13 = vadd.f32 %v119_v8, %v114_v10  ;;  %v122_v15 = vadd.f32 %v120_v12, %v117_v11 }
  0x9d   :  { %v123_v14 = vsel %vm89_vm0, %v121_v13, 0.0  ;;  %v129_v16 = vmul.f32 %v121_v13, %v121_v13  ;;  %v130_v18 = vmul.f32 %v122_v15, %v122_v15  ;;  %v126_v19 = vsel %vm89_vm0, %v122_v15, 0.0 }
  0x9e   :  { %124 = vadd.xlane.f32.xlu0 %v123_v14 }
  0x9f   :  { %v131_v17 = vsel %vm89_vm0, %v129_v16, 0.0  ;;  %v134_v20 = vsel %vm89_vm0, %v130_v18, 0.0 }
  0xa0   :  { %132 = vadd.xlane.f32.xlu1 %v131_v17 }
  0xa6   :  { %127 = vadd.xlane.f32.xlu0 %v126_v19 }
  0xa8   :  { %135 = vadd.xlane.f32.xlu1 %v134_v20 }
 0x111   :  { %v125_v21 = vpop.xlane.xlu0 %124 }
 0x112   :  { %v137_v22 = vmul.f32 0.03125, %v125_v21 }
 0x113   :  { %v133_v23 = vpop.xlane.xlu1 %132 }
 0x114   :  { %v141_v24 = vmul.f32 %v137_v22, %v137_v22  ;;  %v139_v25 = vmul.f32 0.03125, %v133_v23  ;;  %v169_v44 = vsub.f32 %v121_v13, %v137_v22 }
 0x116   :  { %v143_v26 = vsub.f32 %v139_v25, %v141_v24 }
 0x118   :  { %v145_v27 = vmax.f32 %v143_v26, 0.0 }
 0x119   :  { %v128_v28 = vpop.xlane.xlu0 %127 }
 0x11a   :  { %v147_v29 = vadd.f32 1e-12, %v145_v27  ;;  %v138_v30 = vmul.f32 0.03125, %v128_v28 }
 0x11b   :  { %v136_v31 = vpop.xlane.xlu1 %135 }
 0x11c   :  { %218 = vrsqrt.f32 %v147_v29  ;;  %v142_v32 = vmul.f32 %v138_v30, %v138_v30  ;;  %v140_v33 = vmul.f32 0.03125, %v136_v31  ;;  %vm155_vm2 = vweird.f32 %v147_v29 }
 0x11d   :  { %v170_v56 = vsub.f32 %v122_v15, %v138_v30 }
 0x11e   :  { %v144_v34 = vsub.f32 %v140_v33, %v142_v32 }
 0x120   :  { %v146_v35 = vmax.f32 %v144_v34, 0.0 }
 0x122   :  { %v219_v36 = vpop.eup %218  ;;  %v148_v38 = vadd.f32 1e-12, %v146_v35 }
 0x123   :  { %v150_v37 = vmul.f32 %v219_v36, %v147_v29  ;;  %vm156_vm1 = vweird.f32 %v219_v36 }
 0x124   :  { %220 = vrsqrt.f32 %v148_v38  ;;  %vm157_vm3 = vmor %vm155_vm2, %vm156_vm1  ;;  %vm165_vm5 = vweird.f32 %v148_v38 }
 0x125   :  { %v151_v39 = vmul.f32 %v219_v36, %v150_v37 }
 0x127   :  { %v152_v40 = vmul.f32 0.5, %v151_v39 }
 0x129   :  { %v153_v41 = vsub.f32 1.5, %v152_v40 }
 0x12a   :  { %v221_v42 = vpop.eup %220 }
 0x12b   :  { %v154_v43 = vmul.f32 %v219_v36, %v153_v41  ;;  %v160_v45 = vmul.f32 %v221_v42, %v148_v38  ;;  %vm166_vm4 = vweird.f32 %v221_v42 }
 0x12c   :  { %vm167_vm6 = vmor %vm165_vm5, %vm166_vm4 }
 0x12d   :  { %v158_v47 = vsel %vm157_vm3, %v219_v36, %v154_v43  ;;  %v161_v49 = vmul.f32 %v221_v42, %v160_v45 }
 0x12e   :  { %v171_v48 = vmul.f32 %v169_v44, %v158_v47 }
 0x12f   :  { %v162_v51 = vmul.f32 0.5, %v161_v49 }
 0x130   :  { %v174_v52 = vmul.f32 %v216_v46, %v171_v48 }
 0x131   :  { %v163_v53 = vsub.f32 1.5, %v162_v51 }
 0x132   :  { %v177_v54 = vadd.f32 %v217_v50, %v174_v52 }
 0x133   :  { %v164_v55 = vmul.f32 %v221_v42, %v163_v53 }
 0x134   :  { %179 = vst.msk [vmem:[#allocation10] sm:$0xff] %vm89_vm0, %v177_v54 }
 0x135   :  { %v168_v57 = vsel %vm167_vm6, %v221_v42, %v164_v55 }
 0x136   :  { %v172_v58 = vmul.f32 %v170_v56, %v168_v57 }
 0x138   :  { %v175_v59 = vmul.f32 %v216_v46, %v172_v58 }
 0x13a   :  { %v178_v60 = vadd.f32 %v217_v50, %v175_v59 }
 0x13c   :  { %180 = vst.msk [vmem:[#allocation10 + $0x8] sm:$0xff] %vm89_vm0, %v178_v60 }
 0x13d   :  { %193 = dma.vmem_to_hbm [thread:$0]  %s186_s8, 256, %s188_s11, [#allocation4], %s351_s23, %s351_s23, %s352_s24  }
 0x13e   :  { %348 = dma.done.wait [#allocation4], 256  }
 0x13f   :  { %349 = vsyncadd [#allocation4], 4294967040 }
 0x140   :  { %198 = vsyncpa [#allocation3], 1 }
 0x141   :  { %199 = vsyncpa [#allocation6], 1 }
 0x142   :  { %200 = vsyncpa [#allocation9], 1 }
 0x143   :  { %201 = vsyncpa [#allocation4], 1 }

</bundles_post_ra>
